<compile_context>
chip_gen: v7x
topology: tpu7x:2x2x1
jax: 0.10.0
libtpu: 0.0.40
codegen_flags: <defaults>
</compile_context>

<pallas_src>
import jax
import jax.numpy as jnp
from jax import lax
from jax.experimental import pallas as pl
from jax.experimental.pallas import tpu as pltpu


# ---------------------------------------------------------------------------
# Kernels
# ---------------------------------------------------------------------------

def _se_kernel_cf(x_ref, w1_ref, w2_ref, o_ref):
    """Channels-first block: x_ref (Bt, C, HW); pool over the lane (HW) axis.

    w1_ref: (Cr, C)  nn.Linear(C, C//r, bias=False).weight
    w2_ref: (C, Cr)  nn.Linear(C//r, C, bias=False).weight
    """
    # Squeeze: global average pool, f32 accumulation, no full-block upcast.
    pooled = jnp.mean(x_ref[...], axis=2, dtype=jnp.float32)            # (Bt, C)

    # Excitation: FC -> ReLU -> FC -> Sigmoid (f32 accumulate on the MXU).
    h = lax.dot_general(pooled, w1_ref[...], (((1,), (1,)), ((), ())),
                        preferred_element_type=jnp.float32)             # (Bt, Cr)
    h = jnp.maximum(h, 0.0)
    g = lax.dot_general(h, w2_ref[...], (((1,), (1,)), ((), ())),
                        preferred_element_type=jnp.float32)             # (Bt, C)
    g = jax.nn.sigmoid(g)

    # Scale: gate multiply in the I/O dtype (gate in [0,1], numerically benign).
    gate = g[:, :, None].astype(o_ref.dtype)
    o_ref[...] = (x_ref[...] * gate).astype(o_ref.dtype)


def _se_kernel_cl(x_ref, w1_ref, w2_ref, o_ref):
    """Channels-last block: x_ref (Bt, HW, C); pool over the sublane (HW) axis."""
    pooled = jnp.mean(x_ref[...], axis=1, dtype=jnp.float32)            # (Bt, C)

    h = lax.dot_general(pooled, w1_ref[...], (((1,), (1,)), ((), ())),
                        preferred_element_type=jnp.float32)             # (Bt, Cr)
    h = jnp.maximum(h, 0.0)
    g = lax.dot_general(h, w2_ref[...], (((1,), (1,)), ((), ())),
                        preferred_element_type=jnp.float32)             # (Bt, C)
    g = jax.nn.sigmoid(g)

    gate = g[:, None, :].astype(o_ref.dtype)
    o_ref[...] = (x_ref[...] * gate).astype(o_ref.dtype)


# ---------------------------------------------------------------------------
# Tiling / chip heuristics
# ---------------------------------------------------------------------------

def _chip_info():
    """Returns (vmem_capacity_bytes, num_tensorcores_per_chip)."""
    vmem = 128 << 20
    try:
        info = pltpu.get_tpu_info()
        vmem = int(getattr(info, "vmem_capacity_bytes", vmem))
    except Exception:
        pass
    kind = ""
    try:
        kind = jax.devices()[0].device_kind.lower()
    except Exception:
        pass
    # v7x: 64 MiB VMEM per TensorCore and 2 TensorCores per chip; v5e/v6e: 128 MiB, 1 TC.
    if vmem <= (64 << 20) or "v7" in kind:
        return min(vmem, 64 << 20), 2
    return vmem, 1


def _pick_batch_tile(B, per_sample_bytes, target_bytes, min_steps):
    """Largest Bt with Bt*per_sample_bytes <= target_bytes, keeping >= min_steps
    grid steps (only requested on 2-TensorCore chips)."""
    bt = max(1, min(B, target_bytes // max(per_sample_bytes, 1)))
    if min_steps > 1 and B >= min_steps:
        bt = min(bt, max(1, -(-B // min_steps)))   # ceil(B / min_steps)
    return bt


# ---------------------------------------------------------------------------
# Wrapper
# ---------------------------------------------------------------------------

def se_layer(x_nchw, w1, w2):
    """Squeeze-and-Excitation forward.

    x_nchw: (B, C, H, W)
    w1:     (C // reduction, C)   nn.Linear(C, C//r, bias=False).weight
    w2:     (C, C // reduction)   nn.Linear(C//r, C, bias=False).weight
    returns (B, C, H, W), same dtype as x.
    """
    B, C, H, W = x_nchw.shape
    HW = H * W
    Cr = w1.shape[0]
    assert w1.shape == (Cr, C) and w2.shape == (C, Cr)

    vmem_cap, num_cores = _chip_info()
    soft_cap = (vmem_cap * 3) // 4              # ~48 MiB on v7x, ~96 MiB on v5e/v6e

    itemsize = jnp.dtype(x_nchw.dtype).itemsize
    w_bytes = (w1.size * jnp.dtype(w1.dtype).itemsize
               + w2.size * jnp.dtype(w2.dtype).itemsize)
    slack = 4 << 20                              # f32 temps + compiler internal scratch

    # Block target: ~8 MiB, but never more than what 4x double-buffered blocks
    # plus weights plus slack allow under the soft VMEM cap.
    target_block = min(8 << 20, max(1 << 20, (soft_cap - 2 * w_bytes - slack) // 4))

    # Only 2-TC chips (v7x) benefit from >= 2 parallel grid steps.
    min_steps = 2 if (num_cores >= 2 and B >= 2) else 1

    per_sample_bytes = C * HW * itemsize
    Bt = _pick_batch_tile(B, per_sample_bytes, target_block, min_steps)
    grid_b = pl.cdiv(B, Bt)                      # ragged last tile handled by Pallas

    block_bytes = Bt * per_sample_bytes          # honest: in-kernel dtype == input dtype
    required = 4 * block_bytes + 2 * w_bytes + slack
    vmem_limit = int(min(max(required, 8 << 20), soft_cap))

    compiler_params = pltpu.CompilerParams(
        dimension_semantics=("parallel",),
        vmem_limit_bytes=vmem_limit,
    )

    # Channels-last in-kernel layout keeps stores lane-dense when HW isn't a
    # multiple of 128 but C is (e.g. 14x14 / 7x7 feature maps with C=128..512).
    channels_last = (HW % 128 != 0) and (C % 128 == 0)

    if channels_last:
        x = jnp.transpose(x_nchw.reshape(B, C, HW), (0, 2, 1))   # (B, HW, C)
        out = pl.pallas_call(
            _se_kernel_cl,
            out_shape=jax.ShapeDtypeStruct((B, HW, C), x.dtype),
            grid=(grid_b,),
            in_specs=[
                pl.BlockSpec((Bt, HW, C), lambda b: (b, 0, 0)),
                pl.BlockSpec((Cr, C), lambda b: (0, 0)),   # VMEM-resident weights
                pl.BlockSpec((C, Cr), lambda b: (0, 0)),
            ],
            out_specs=pl.BlockSpec((Bt, HW, C), lambda b: (b, 0, 0)),
            compiler_params=compiler_params,
        )(x, w1, w2)
        return jnp.transpose(out, (0, 2, 1)).reshape(B, C, H, W)

    x = x_nchw.reshape(B, C, HW)
    out = pl.pallas_call(
        _se_kernel_cf,
        out_shape=jax.ShapeDtypeStruct((B, C, HW), x.dtype),
        grid=(grid_b,),
        in_specs=[
            pl.BlockSpec((Bt, C, HW), lambda b: (b, 0, 0)),
            pl.BlockSpec((Cr, C), lambda b: (0, 0)),       # VMEM-resident weights
            pl.BlockSpec((C, Cr), lambda b: (0, 0)),
        ],
        out_specs=pl.BlockSpec((Bt, C, HW), lambda b: (b, 0, 0)),
        compiler_params=compiler_params,
    )(x, w1, w2)
    return out.reshape(B, C, H, W)


# ---------------------------------------------------------------------------
# Reference + self-test
# ---------------------------------------------------------------------------

def _reference(x, w1, w2):
    """Plain-JAX reference matching the PyTorch forward."""
    y = jnp.mean(x.astype(jnp.float32), axis=(2, 3))          # (B, C)
    y = jnp.maximum(y @ w1.T.astype(jnp.float32), 0.0)        # (B, Cr)
    y = jax.nn.sigmoid(y @ w2.T.astype(jnp.float32))          # (B, C)
    return (x.astype(jnp.float32) * y[:, :, None, None]).astype(x.dtype)


if __name__ == "__main__":
    reduction = 16

    # Primary check: B=2, C=32, 16x16 (HW=256 is lane-dense -> channels-first path).
    B, C, H, W = 2, 32, 16, 16
    Cr = C // reduction
    kx, k1, k2 = jax.random.split(jax.random.PRNGKey(0), 3)
    x = jax.random.normal(kx, (B, C, H, W), dtype=jnp.float32)
    w1 = jax.random.normal(k1, (Cr, C), dtype=jnp.float32) * (1.0 / jnp.sqrt(C))
    w2 = jax.random.normal(k2, (C, Cr), dtype=jnp.float32) * (1.0 / jnp.sqrt(Cr))

    out = jax.block_until_ready(se_layer(x, w1, w2))
    assert out.shape == (B, C, H, W)
    assert jnp.allclose(out, _reference(x, w1, w2), atol=1e-5, rtol=1e-5), \
        "mismatch vs reference (channels-first)"

    # Ragged cdiv batch tiling check (B=3, not a multiple of any forced tile).
    kx3, = jax.random.split(jax.random.PRNGKey(1), 1)
    x3 = jax.random.normal(kx3, (3, C, H, W), dtype=jnp.float32)
    out3 = jax.block_until_ready(se_layer(x3, w1, w2))
    assert jnp.allclose(out3, _reference(x3, w1, w2), atol=1e-5, rtol=1e-5), \
        "mismatch vs reference (ragged batch)"

    # Channels-last layout check (HW=196 not a multiple of 128, C=128 lane-dense).
    B2, C2, H2, W2 = 2, 128, 14, 14
    Cr2 = C2 // reduction
    ka, kb, kc = jax.random.split(jax.random.PRNGKey(2), 3)
    x2 = jax.random.normal(ka, (B2, C2, H2, W2), dtype=jnp.float32)
    w1b = jax.random.normal(kb, (Cr2, C2), dtype=jnp.float32) * (1.0 / jnp.sqrt(C2))
    w2b = jax.random.normal(kc, (C2, Cr2), dtype=jnp.float32) * (1.0 / jnp.sqrt(Cr2))
    out2 = jax.block_until_ready(se_layer(x2, w1b, w2b))
    assert jnp.allclose(out2, _reference(x2, w1b, w2b), atol=1e-3, rtol=1e-3), \
        "mismatch vs reference (channels-last)"

    print("KERNEL_OK")
</pallas_src>

<mosaic_0001>
module attributes {stable_mosaic.version = 11 : i64} {
  func.func @_se_kernel_cf(%arg0: i32, %arg1: memref<2x32x256xf32, #tpu.memory_space<vmem>>, %arg2: memref<2x32xf32, #tpu.memory_space<vmem>>, %arg3: memref<32x2xf32, #tpu.memory_space<vmem>>, %arg4: memref<2x32x256xf32, #tpu.memory_space<vmem>>) attributes {dimension_semantics = [#tpu.dimension_semantics<parallel>], iteration_bounds = array<i64: 1>, scalar_prefetch = 0 : i64, scratch_operands = 0 : i64, tpu.core_type = #tpu.core_type<tc>, window_params = [{transform_indices = @transform_0, window_bounds = array<i64: 2, 32, 256>}, {pipeline_mode = #tpu.pipeline_mode<synchronous>, transform_indices = @transform_1, window_bounds = array<i64: 2, 32>}, {pipeline_mode = #tpu.pipeline_mode<synchronous>, transform_indices = @transform_2, window_bounds = array<i64: 32, 2>}, {transform_indices = @transform_3, window_bounds = array<i64: 2, 32, 256>}]} {
    %c0 = arith.constant 0 : index
    %c0_0 = arith.constant 0 : index
    %c0_1 = arith.constant 0 : index
    %0 = vector.load %arg1[%c0, %c0_0, %c0_1] : memref<2x32x256xf32, #tpu.memory_space<vmem>>, vector<2x32x256xf32>
    %cst = arith.constant dense<0.000000e+00> : vector<2x32xf32>
    %1 = vector.multi_reduction <add>, %0, %cst [2] : vector<2x32x256xf32> to vector<2x32xf32>
    %cst_2 = arith.constant 2.560000e+02 : f32
    %2 = vector.broadcast %cst_2 : f32 to vector<2x32xf32>
    %3 = arith.divf %1, %2 : vector<2x32xf32>
    %c0_3 = arith.constant 0 : index
    %c0_4 = arith.constant 0 : index
    %4 = vector.load %arg2[%c0_3, %c0_4] : memref<2x32xf32, #tpu.memory_space<vmem>>, vector<2x32xf32>
    %cst_5 = arith.constant dense<0.000000e+00> : vector<2x2xf32>
    %5 = tpu.matmul %3, %4, %cst_5 {dimension_numbers = #tpu.dot_dimension_numbers<[1], [1], [0], [0], [0, 0, 1, 0], [], []>} : vector<2x32xf32>, vector<2x32xf32>, vector<2x2xf32> -> vector<2x2xf32>
    %cst_6 = arith.constant 0.000000e+00 : f32
    %6 = vector.broadcast %cst_6 : f32 to vector<2x2xf32>
    %7 = arith.maximumf %5, %6 : vector<2x2xf32>
    %c0_7 = arith.constant 0 : index
    %c0_8 = arith.constant 0 : index
    %8 = vector.load %arg3[%c0_7, %c0_8] : memref<32x2xf32, #tpu.memory_space<vmem>>, vector<32x2xf32>
    %cst_9 = arith.constant dense<0.000000e+00> : vector<2x32xf32>
    %9 = tpu.matmul %7, %8, %cst_9 {dimension_numbers = #tpu.dot_dimension_numbers<[1], [1], [0], [0], [0, 0, 1, 0], [], []>} : vector<2x2xf32>, vector<32x2xf32>, vector<2x32xf32> -> vector<2x32xf32>
    %10 = arith.negf %9 : vector<2x32xf32>
    %11 = math.exp %10 : vector<2x32xf32>
    %cst_10 = arith.constant 1.000000e+00 : f32
    %12 = vector.broadcast %cst_10 : f32 to vector<2x32xf32>
    %13 = arith.addf %12, %11 : vector<2x32xf32>
    %14 = arith.divf %12, %13 : vector<2x32xf32>
    %15 = vector.shape_cast %14 : vector<2x32xf32> to vector<2x32x1xf32>
    %c0_11 = arith.constant 0 : index
    %c0_12 = arith.constant 0 : index
    %c0_13 = arith.constant 0 : index
    %16 = vector.load %arg1[%c0_11, %c0_12, %c0_13] : memref<2x32x256xf32, #tpu.memory_space<vmem>>, vector<2x32x256xf32>
    %17 = vector.broadcast %15 : vector<2x32x1xf32> to vector<2x32x256xf32>
    %18 = arith.mulf %16, %17 : vector<2x32x256xf32>
    %c0_14 = arith.constant 0 : index
    %c0_15 = arith.constant 0 : index
    %c0_16 = arith.constant 0 : index
    %19 = vector.load %arg4[%c0_14, %c0_15, %c0_16] : memref<2x32x256xf32, #tpu.memory_space<vmem>>, vector<2x32x256xf32>
    tpu.vector_store %arg4[%c0_14, %c0_15, %c0_16], %18 {strides = array<i32>} : memref<2x32x256xf32, #tpu.memory_space<vmem>>, vector<2x32x256xf32>,
    return
  }
  func.func @transform_0(%arg0: i32) -> (i32, i32, i32) {
    %c0_i32 = arith.constant 0 : i32
    %c0_i32_0 = arith.constant 0 : i32
    %c0_i32_1 = arith.constant 0 : i32
    return %arg0, %c0_i32, %c0_i32_0 : i32, i32, i32
  }
  func.func @transform_1(%arg0: i32) -> (i32, i32) {
    %c0_i32 = arith.constant 0 : i32
    %c0_i32_0 = arith.constant 0 : i32
    %c0_i32_1 = arith.constant 0 : i32
    return %c0_i32, %c0_i32_0 : i32, i32
  }
  func.func @transform_2(%arg0: i32) -> (i32, i32) {
    %c0_i32 = arith.constant 0 : i32
    %c0_i32_0 = arith.constant 0 : i32
    %c0_i32_1 = arith.constant 0 : i32
    return %c0_i32, %c0_i32_0 : i32, i32
  }
  func.func @transform_3(%arg0: i32) -> (i32, i32, i32) {
    %c0_i32 = arith.constant 0 : i32
    %c0_i32_0 = arith.constant 0 : i32
    %c0_i32_1 = arith.constant 0 : i32
    return %arg0, %c0_i32, %c0_i32_0 : i32, i32, i32
  }
}

</mosaic_0001>

<bundles_post_ra>
// kernel: tpu_custom_call.1
= control target key start
LH: loop header
LB: loop body
LE: loop exit
PB: predicated region body
PF: predicated region fallthrough
CT: control target
= control target key end

     0   :  { %8 = vsyncpa [#allocation3], 0  ;;  %s634_s0 = inlined_call_operand.hbm [shape: f32[2,32,256], index: 0, kind: input, shape index: {}]   ;;  %s635_s1 = inlined_call_operand.vmem [shape: f32[2,32], index: 1, kind: input, shape index: {}]   ;;  %s636_s2 = inlined_call_operand.vmem [shape: f32[32,2], index: 2, kind: input, shape index: {}]   ;;  %s637_s3 = inlined_call_operand.hbm [shape: f32[2,32,256], index: 3, kind: output, shape index: {}]  }
   0x1   :  { %9 = vsyncpa [#allocation4], 0  ;;  %s493_s12 = smov [#allocation2]   ;;  %s445_s16 = scalar_lea.hbm %s634_s0, 2048 }
   0x2   :  { %s15_s13 = sshll.u32 %s493_s12, 4  ;;  %p446_p0 = scmp.ne.s32.totalorder %s634_s0, %s445_s16  ;;  %s16_s13 = int_to_ptr.vmem [resolvable:$true] %s15_s13 }
   0x3   :  { %p449_p1 = scmp.lt.u32.totalorder %s445_s16, %s634_s0 }
   0x5   :  { %p451_p2 = pnand %p449_p1, %p446_p0 }
   0x7   :  { %454 = shalt.err (!%p451_p2)
}
   0x8   :  { %s455_s21 = scalar_lea.vmem %s16_s13, 2048  ;;  %p460_p4 = scmp.lt.s32.totalorder %s16_s13, %s16_s13 }
   0x9   :  { %p456_p3 = scmp.ne.s32.totalorder %s16_s13, %s455_s21  ;;  %p461_p5 = scmp.lt.s32.totalorder %s455_s21, %s455_s21 }
   0xb   :  { %p462_p6 = por %p461_p5, %p460_p4 }
   0xd   :  { %p463_p7 = pnand %p462_p6, %p456_p3 }
   0xf   :  { %466 = shalt.err (!%p463_p7)
}
  0x10   :  { %s494_s22 = smov 256   ;;  %s495_s23 = smov 16  }
  0x11   :  { %21 = dma.hbm_to_vmem [thread:$0]  %s634_s0, 2048, %s16_s13, [#allocation3], %s494_s22, %s494_s22, %s495_s23  }
  0x12   :  { %489 = dma.done.wait [#allocation3], 2048  }
  0x13   :  { %490 = vsyncadd [#allocation3], 4294965248  ;;  %v535_v0 = vld [vmem:[#allocation2 + $0x40] sm:$0xff]  ;;  %v537_v1 = vld [vmem:[#allocation2 + $0x48] sm:$0xff]  ;;  %v496_v24 = vmov 0.0   ;;  %vm135_vm0 = vcmask 261120   ;;  %v87_v33 = vlaneseq }
  0x14   :  { %v539_v2 = vld [vmem:[#allocation2] sm:$0xff]  ;;  %v57_v3 = vadd.f32 %v537_v1, %v535_v0  ;;  %v543_v4 = vld [vmem:[#allocation2 + $0x8] sm:$0xff]  ;;  %v545_v5 = vld [vmem:[#allocation2 + $0x50] sm:$0xff]  ;;  %410 = vmatprep.subr.mxu0 %v496_v24  ;;  %vm497_vm1 = vmmov 0   ;;  %vm216_vm2 = vcmask 15360   ;;  %v498_v28 = vmov 0.0|0.0  }
  0x15   :  { %v547_v6 = vld [vmem:[#allocation2 + $0x58] sm:$0xff]  ;;  %v45_v7 = vadd.f32 %v543_v4, %v539_v2  ;;  %v551_v8 = vld [vmem:[#allocation2 + $0x10] sm:$0xff]  ;;  %v559_v12 = vld [vmem:[#allocation2 + $0x60] sm:$0xff]  ;;  %412 = vmatprep.mubr.msk.f32.mxu0 %vm497_vm1, %v496_v24  ;;  %423 = vmatprep.mubr.msk.f32.mxu1 %vm497_vm1, %v496_v24  ;;  %v88_v35 = vand.u32 127, %v87_v33  ;;  %v90_v40 = vshrl.u32 %v87_v33, 7  ;;  %vm98_vm4 = vcmask 130112  }
  0x16   :  { %v553_v9 = vld [vmem:[#allocation2 + $0x18] sm:$0xff]  ;;  %58 = vadd.xlane.f32.xlu1 %v57_v3  ;;  %v60_v10 = vadd.f32 %v547_v6, %v545_v5  ;;  %v561_v13 = vld [vmem:[#allocation2 + $0x68] sm:$0xff]  ;;  %v563_v14 = vld [vmem:[#allocation2 + $0x20] sm:$0xff]  ;;  %426 = vmatprep.subr.bf16.mxu1 %v498_v28  ;;  %vm105_vm5 = vcmask 195712   ;;  %vm112_vm6 = vcmask 261312   ;;  %vm133_vm7 = vcmask 1041409  }
  0x17   :  { %46 = vadd.xlane.f32.xlu0 %v45_v7  ;;  %v48_v11 = vadd.f32 %v553_v9, %v551_v8  ;;  %v565_v15 = vld [vmem:[#allocation2 + $0x28] sm:$0xff]  ;;  %v63_v16 = vadd.f32 %v561_v13, %v559_v12  ;;  %v571_v18 = vld [vmem:[#allocation2 + $0x70] sm:$0xff]  ;;  %v573_v19 = vld [vmem:[#allocation2 + $0x78] sm:$0xff]  ;;  %v93_v37 = vadd.s32 4294967288, %v88_v35  ;;  %v100_v39 = vadd.s32 4294967280, %v88_v35 }
  0x18   :  { %v51_v17 = vadd.f32 %v565_v15, %v563_v14  ;;  %v575_v20 = vld [vmem:[#allocation2 + $0x30] sm:$0xff]  ;;  %v577_v21 = vld [vmem:[#allocation2 + $0x38] sm:$0xff]  ;;  %v66_v22 = vadd.f32 %v573_v19, %v571_v18  ;;  %v78_v25 = vld [vmem:[%s635_s1] sm:$0x3]  ;;  %v107_v44 = vadd.s32 4294967272, %v88_v35  ;;  %v91_v48 = vsub.s32 %v88_v35, %v90_v40 }
  0x19   :  { %v54_v23 = vadd.f32 %v577_v21, %v575_v20  ;;  %411 = vmatpush3.xpose.msk.msra.mxu0 %vm135_vm0, %v78_v25  ;;  %v212_v26 = vld [vmem:[%s636_s2] sm:$0xff]  ;;  %v213_v27 = vld [vmem:[%s636_s2 + $0x8] sm:$0xff]  ;;  %vm428_vm3 = vmpackc.low %vm216_vm2, %vm216_vm2  ;;  %v96_v42 = vsub.s32 %v93_v37, %v90_v40  ;;  %v103_v46 = vsub.s32 %v100_v39, %v90_v40  ;;  %v329_v37 = vsub.s32 1, %v90_v40 }
  0x1a   :  { %61 = vadd.xlane.f32.xlu1 %v60_v10  ;;  %v427_v29 = vpack.c.bf16 %v213_v27, %v212_v26  ;;  %v214_v30 = vld [vmem:[%s636_s2 + $0x10] sm:$0xff]  ;;  %v215_v31 = vld [vmem:[%s636_s2 + $0x18] sm:$0xff]  ;;  %v110_v55 = vsub.s32 %v107_v44, %v90_v40  ;;  %s499_s2 = smov [#allocation5]  }
  0x1b   :  { %49 = vadd.xlane.f32.xlu0 %v48_v11  ;;  %v431_v32 = vpack.c.bf16 %v215_v31, %v214_v30  ;;  %s383_s7 = sshll.u32 %s499_s2, 4  ;;  %s384_s7 = int_to_ptr.vmem [resolvable:$true] %s383_s7 }
  0x1c   :  { %429 = vmatpush3.bf16.xpose.msk.msra.mxu1 %vm428_vm3, %v427_v29  ;;  %s467_s8 = scalar_lea.vmem %s384_s7, 2048  ;;  %p472_p9 = scmp.lt.s32.totalorder %s384_s7, %s384_s7 }
  0x1d   :  { %430 = vmatprep.subr.bf16.mxu1 %v498_v28  ;;  %p468_p8 = scmp.ne.s32.totalorder %s384_s7, %s467_s8  ;;  %p473_p10 = scmp.lt.s32.totalorder %s467_s8, %s467_s8 }
  0x1e   :  { %64 = vadd.xlane.f32.xlu1 %v63_v16 }
  0x1f   :  { %52 = vadd.xlane.f32.xlu0 %v51_v17  ;;  %p474_p11 = por %p473_p10, %p472_p9 }
  0x21   :  { %p475_p12 = pnand %p474_p11, %p468_p8 }
  0x22   :  { %67 = vadd.xlane.f32.xlu1 %v66_v22 }
  0x23   :  { %55 = vadd.xlane.f32.xlu0 %v54_v23 }
  0x24   :  { %433 = vmatpush3.bf16.xpose.msk.msra.mxu1 %vm428_vm3, %v431_v32 }
  0xa3   :  { %v59_v34 = vpop.xlane.xlu1 %58 }
  0xa4   :  { %v47_v36 = vpop.xlane.xlu0 %46  ;;  %v74_v49 = vmul.f32 0.00390625, %v59_v34  ;;  %v310_v34 = vsub.s32 0, %v90_v40 }
  0xa5   :  { %v70_v52 = vmul.f32 0.00390625, %v47_v36 }
  0xa6   :  { %v117_v59 = vrot.slane %v74_v49, %v91_v48 }
  0xa7   :  { %v62_v38 = vpop.xlane.xlu1 %61  ;;  %v92_v63 = vrot.slane %v70_v52, %v91_v48 }
  0xa8   :  { %v50_v41 = vpop.xlane.xlu0 %49  ;;  %v75_v43 = vmul.f32 0.00390625, %v62_v38 }
  0xa9   :  { %v71_v45 = vmul.f32 0.00390625, %v50_v41 }
  0xaa   :  { %v121_v54 = vrot.slane %v75_v43, %v96_v42 }
  0xab   :  { %v65_v47 = vpop.xlane.xlu1 %64  ;;  %v97_v56 = vrot.slane %v71_v45, %v96_v42 }
  0xac   :  { %v76_v50 = vmul.f32 0.00390625, %v65_v47  ;;  %v53_v51 = vpop.xlane.xlu0 %52  ;;  %v122_v7 = vsel %vm98_vm4, %v121_v54, %v117_v59 }
  0xad   :  { %v72_v53 = vmul.f32 0.00390625, %v53_v51  ;;  %v99_v11 = vsel %vm98_vm4, %v97_v56, %v92_v63 }
  0xae   :  { %v126_v57 = vrot.slane %v76_v50, %v103_v46 }
  0xaf   :  { %v68_v58 = vpop.xlane.xlu1 %67  ;;  %v104_v60 = vrot.slane %v72_v53, %v103_v46 }
  0xb0   :  { %v77_v61 = vmul.f32 0.00390625, %v68_v58  ;;  %v56_v62 = vpop.xlane.xlu0 %55  ;;  %v127_v16 = vsel %vm105_vm5, %v126_v57, %v122_v7 }
  0xb1   :  { %v73_v3 = vmul.f32 0.00390625, %v56_v62  ;;  %v106_v22 = vsel %vm105_vm5, %v104_v60, %v99_v11 }
  0xb2   :  { %v131_v10 = vrot.slane %v77_v61, %v110_v55 }
  0xb3   :  { %v111_v17 = vrot.slane %v73_v3, %v110_v55 }
  0xb4   :  { %v132_v23 = vsel %vm112_vm6, %v131_v10, %v127_v16 }
  0xb5   :  { %v113_v24 = vsel %vm112_vm6, %v111_v17, %v106_v22 }
  0xb6   :  { %v134_v25 = vsel %vm133_vm7, %v132_v23, %v113_v24 }
  0xb7   :  { %413 = vmatmul.mubr.msk.f32.vlgmr.msra.gmra.mrb[0].mxu0 %vm135_vm0, %v134_v25 }
 0x18a   :  { %v207_v26 = vpop.f32.mrb[0].mxu0 }
 0x18b   :  { %v211_v27 = vmax.f32 %v207_v26, 0.0  ;;  %v414_v28 = vpop.f32.mrb[1].mxu0 }
 0x18d   :  { %424 = vmatmul.mubr.msk.f32.vlgmr.msra.gmra.mrb[0].mxu1 %vm216_vm2, %v211_v27 }
 0x260   :  { %v298_v29 = vpop.f32.mrb[0].mxu1 }
 0x261   :  { %v402_v30 = vmul.f32 -1.442695, %v298_v29  ;;  %v425_v31 = vpop.f32.mrb[1].mxu1 }
 0x263   :  { %441 = vpow2.f32 %v402_v30 }
 0x26d   :  { %v442_v32 = vpop.eup %441 }
 0x26e   :  { %v305_v33 = vadd.f32 1.0, %v442_v32 }
 0x270   :  { %443 = vrcp.f32 %v305_v33 }
 0x27a   :  { %v444_v35 = vpop.eup %443 }
 0x27b   :  { %v311_v36 = vrot.slane %v444_v35, %v310_v34  ;;  %v330_v38 = vrot.slane %v444_v35, %v329_v37 }
 0x27d   :  { %317 = vbcast.lane.b32.xlu1 %v311_v36, 264  ;;  %313 = vbcast.lane.b32.xlu0 %v311_v36, 256 }
 0x281   :  { %321 = vbcast.lane.b32.xlu1 %v311_v36, 272  ;;  %332 = vbcast.lane.b32.xlu0 %v330_v38, 256 }
 0x285   :  { %325 = vbcast.lane.b32.xlu1 %v311_v36, 280  ;;  %340 = vbcast.lane.b32.xlu0 %v330_v38, 272 }
 0x289   :  { %336 = vbcast.lane.b32.xlu1 %v330_v38, 264 }
 0x28d   :  { %344 = vbcast.lane.b32.xlu1 %v330_v38, 280 }
 0x2ef   :  { %v318_v39 = vpop.permute.xlu1 %317  ;;  %v314_v41 = vpop.permute.xlu0 %313 }
 0x2f0   :  { %v348_v42 = vmul.f32 %v318_v39, %v551_v8  ;;  %v349_v43 = vmul.f32 %v318_v39, %v553_v9  ;;  %v346_v44 = vmul.f32 %v314_v41, %v539_v2  ;;  %v347_v45 = vmul.f32 %v314_v41, %v543_v4 }
 0x2f2   :  { %364 = vst [vmem:[#allocation5 + $0x10] sm:$0xff] %v348_v42  ;;  %365 = vst [vmem:[#allocation5 + $0x18] sm:$0xff] %v349_v43 }
 0x2f3   :  { %362 = vst [vmem:[#allocation5] sm:$0xff] %v346_v44  ;;  %363 = vst [vmem:[#allocation5 + $0x8] sm:$0xff] %v347_v45  ;;  %v322_v40 = vpop.permute.xlu1 %321  ;;  %v333_v46 = vpop.permute.xlu0 %332 }
 0x2f4   :  { %v350_v47 = vmul.f32 %v322_v40, %v563_v14  ;;  %v351_v48 = vmul.f32 %v322_v40, %v565_v15  ;;  %v354_v49 = vmul.f32 %v333_v46, %v535_v0  ;;  %v355_v8 = vmul.f32 %v333_v46, %v537_v1 }
 0x2f6   :  { %366 = vst [vmem:[#allocation5 + $0x20] sm:$0xff] %v350_v47  ;;  %367 = vst [vmem:[#allocation5 + $0x28] sm:$0xff] %v351_v48 }
 0x2f7   :  { %370 = vst [vmem:[#allocation5 + $0x40] sm:$0xff] %v354_v49  ;;  %371 = vst [vmem:[#allocation5 + $0x48] sm:$0xff] %v355_v8  ;;  %v326_v2 = vpop.permute.xlu1 %325  ;;  %v341_v4 = vpop.permute.xlu0 %340 }
 0x2f8   :  { %v352_v9 = vmul.f32 %v326_v2, %v575_v20  ;;  %v353_v50 = vmul.f32 %v326_v2, %v577_v21  ;;  %v358_v51 = vmul.f32 %v341_v4, %v559_v12  ;;  %v359_v14 = vmul.f32 %v341_v4, %v561_v13 }
 0x2fa   :  { %368 = vst [vmem:[#allocation5 + $0x30] sm:$0xff] %v352_v9  ;;  %369 = vst [vmem:[#allocation5 + $0x38] sm:$0xff] %v353_v50 }
 0x2fb   :  { %374 = vst [vmem:[#allocation5 + $0x60] sm:$0xff] %v358_v51  ;;  %375 = vst [vmem:[#allocation5 + $0x68] sm:$0xff] %v359_v14  ;;  %v337_v0 = vpop.permute.xlu1 %336 }
 0x2fc   :  { %v356_v1 = vmul.f32 %v337_v0, %v545_v5  ;;  %v357_v15 = vmul.f32 %v337_v0, %v547_v6 }
 0x2fe   :  { %372 = vst [vmem:[#allocation5 + $0x50] sm:$0xff] %v356_v1  ;;  %373 = vst [vmem:[#allocation5 + $0x58] sm:$0xff] %v357_v15 }
 0x2ff   :  { %v345_v20 = vpop.permute.xlu1 %344 }
 0x300   :  { %v360_v21 = vmul.f32 %v345_v20, %v571_v18  ;;  %v361_v12 = vmul.f32 %v345_v20, %v573_v19 }
 0x302   :  { %376 = vst [vmem:[#allocation5 + $0x70] sm:$0xff] %v360_v21  ;;  %377 = vst [vmem:[#allocation5 + $0x78] sm:$0xff] %v361_v12 }
 0x303   :  { %478 = shalt.err (!%p475_p12)
}
 0x304   :  { %s479_s11 = scalar_lea.hbm %s637_s3, 2048 }
 0x305   :  { %p480_p13 = scmp.ne.s32.totalorder %s637_s3, %s479_s11  ;;  %p483_p0 = scmp.lt.u32.totalorder %s479_s11, %s637_s3 }
 0x307   :  { %p485_p1 = pnand %p483_p0, %p480_p13 }
 0x309   :  { %488 = shalt.err (!%p485_p1)
}
 0x30a   :  { %389 = dma.vmem_to_hbm [thread:$0]  %s384_s7, 2048, %s637_s3, [#allocation4], %s494_s22, %s494_s22, %s495_s23  }
 0x30b   :  { %491 = dma.done.wait [#allocation4], 2048  }
 0x30c   :  { %492 = vsyncadd [#allocation4], 4294965248 }
 0x30d   :  { %393 = vsyncpa [#allocation3], 1 }
 0x30e   :  { %394 = vsyncpa [#allocation4], 1 }

</bundles_post_ra>
